<compile_context>
chip_gen: v5e
topology: v5e:2x2
jax: 0.10.0
libtpu: 0.0.40
codegen_flags: <defaults>
</compile_context>

<pallas_src>
import math

import numpy as np

import jax
import jax.numpy as jnp
from jax.experimental import pallas as pl
from jax.experimental.pallas import tpu as pltpu


def _mask_is_statically_false(attn_mask) -> bool:
    """True iff the mask is a concrete array with no True entries."""
    try:
        return not bool(np.any(np.asarray(attn_mask)))
    except Exception:  # tracer / abstract value -> keep the general path
        return False


def _default_grid_steps(batch: int) -> int:
    """1 grid step on single-TC chips (v5e/v6e); 2 on v7x (one per TC)."""
    try:
        kind = jax.devices()[0].device_kind.lower()
    except Exception:
        kind = ""
    if "v7" in kind and batch % 2 == 0:
        return 2
    return 1


def _make_kernel(scale: float, apply_mask: bool):
    def _compute(q_all, k_all, o_ref, mask3):
        # q_all: (Bb, H, Sq, D)   k_all: (B, Bb, Sk, S2)   o_ref: (Bb, H, Sq, S2)
        bb = q_all.shape[0]
        for b in range(bb):                       # tiny static unrolled loop
            s = jnp.einsum("hsd,hdx->hsx", q_all[b], k_all[:, b],
                           preferred_element_type=jnp.float32)
            if mask3 is not None:
                s = jnp.where(mask3, 0.0, s)      # fused masked_fill pair
            o_ref[b] = s.astype(o_ref.dtype)

    if apply_mask:
        def kernel(mask_ref, q_ref, k_ref, o_ref):
            q = q_ref[...] * jnp.asarray(scale, q_ref.dtype)   # scale q, not out
            mask3 = (mask_ref[...] != 0)[None, :, :]           # hoisted, once/step
            _compute(q, k_ref[...], o_ref, mask3)
    else:
        def kernel(q_ref, k_ref, o_ref):
            q = q_ref[...] * jnp.asarray(scale, q_ref.dtype)
            _compute(q, k_ref[...], o_ref, None)
    return kernel


def attention_mask_forward(query, key, value, attn_mask, *,
                           compute_dtype=None, grid_steps=None):
    """Reproduces Model.forward.  `value` is unused in the forward pass."""
    del value  # only used by the PyTorch backward

    B, H, Sq, D = query.shape
    Bk, Hk, Sk, Dk = key.shape
    assert (B, H) == (Bk, Hk), "query / key leading dims must match"
    # torch.matmul batch-broadcasting of (B, H) with (H, B):
    assert B == H, "batch dims must broadcast (B == H)"
    # torch.matmul contracts query's last dim with key's second-to-last dim:
    assert D == Sk, "query.shape[-1] must equal key.shape[-2]"
    S2 = Dk                                     # output last dim
    assert attn_mask.shape == (Sq, S2)

    out_dtype = query.dtype
    scale = 1.0 / math.sqrt(float(D))

    if compute_dtype is not None:               # e.g. jnp.bfloat16 on v6e / v7x
        query = query.astype(compute_dtype)
        key = key.astype(compute_dtype)

    if grid_steps is None:
        grid_steps = _default_grid_steps(B)
    if grid_steps < 1 or B % grid_steps != 0:
        grid_steps = 1
    Bb = B // grid_steps                        # batch indices per grid step

    apply_mask = not _mask_is_statically_false(attn_mask)

    # Full-extent last-two-dims blocks: legal under the (8,128) rule because
    # they equal the full array dims -> no padding, no wrapper pad/slice.
    q_spec = pl.BlockSpec((Bb, H, Sq, D), lambda i: (i, 0, 0, 0))
    # key.transpose(0, 1)[:, batch_chunk] == key[:, batch_chunk]  (B == H)
    k_spec = pl.BlockSpec((B, Bb, Sk, S2), lambda i: (0, i, 0, 0))
    o_spec = pl.BlockSpec((Bb, H, Sq, S2), lambda i: (i, 0, 0, 0))

    in_specs = [q_spec, k_spec]
    args = [query, key]
    mask_bytes = 0
    if apply_mask:
        mask_i8 = attn_mask.astype(jnp.int8)
        in_specs = [pl.BlockSpec((Sq, S2), lambda i: (0, 0))] + in_specs
        args = [mask_i8] + args
        mask_bytes = Sq * S2

    itemsize = jnp.dtype(query.dtype).itemsize
    cost = pl.CostEstimate(
        flops=2 * B * H * Sq * D * S2,
        transcendentals=0,
        bytes_accessed=(B * H * Sq * D * itemsize             # query
                        + Bk * Hk * Sk * S2 * itemsize        # key
                        + mask_bytes                          # int8 mask
                        + B * H * Sq * S2 * jnp.dtype(out_dtype).itemsize))

    out = pl.pallas_call(
        _make_kernel(scale, apply_mask),
        out_shape=jax.ShapeDtypeStruct((B, H, Sq, S2), out_dtype),
        grid_spec=pltpu.PrefetchScalarGridSpec(
            num_scalar_prefetch=0,
            grid=(grid_steps,),
            in_specs=in_specs,
            out_specs=o_spec,
        ),
        compiler_params=pltpu.CompilerParams(
            dimension_semantics=("parallel",)),
        cost_estimate=cost,
    )(*args)
    return out


class Model:
    """JAX mirror of the PyTorch Model (default mask is all-False zeros)."""

    def __init__(self, seq=16):
        self.attn_mask = jnp.zeros((seq, seq), dtype=jnp.bool_)

    def __call__(self, query, key, value):
        # both masked_fill's are fused inside the kernel (single select)
        return attention_mask_forward(query, key, value, self.attn_mask)
    # TODO(synk): the custom autograd backward of Attention_mask is not
    # implemented (only the forward pass was requested).


def _reference(query, key, attn_mask):
    D = query.shape[-1]
    k_t = jnp.transpose(key, (1, 0, 2, 3))            # key.transpose(0, 1)
    s = jnp.matmul(query, k_t) / math.sqrt(D)
    s = jnp.where(attn_mask, -jnp.inf, s)
    s = jnp.where(attn_mask, 0.0, s)
    return s


if __name__ == "__main__":
    # Small, self-consistent shapes: B == H == 4, S == D == 16 (so that the
    # PyTorch-style batch broadcast and the S/D contraction are both valid).
    B, H, S, D = 4, 4, 16, 16
    k0, k1, k2, k3 = jax.random.split(jax.random.PRNGKey(0), 4)
    query = jax.random.normal(k0, (B, H, S, D), dtype=jnp.float32)
    key = jax.random.normal(k1, (B, H, S, D), dtype=jnp.float32)
    value = jax.random.normal(k2, (B, H, S, D), dtype=jnp.float32)

    # 1) default Model (all-False mask -> mask specialized away, auto grid)
    model = Model(seq=S)
    out = jax.block_until_ready(model(query, key, value))
    ref = _reference(query, key, model.attn_mask)
    assert out.shape == (B, H, S, D)
    assert jnp.allclose(out, ref, atol=1e-5, rtol=1e-5)

    # 2) non-trivial mask -> exercises the masked kernel path
    mask = jax.random.bernoulli(k3, 0.3, (S, D))
    out_m = jax.block_until_ready(
        attention_mask_forward(query, key, value, mask))
    ref_m = _reference(query, key, mask)
    assert jnp.allclose(out_m, ref_m, atol=1e-5, rtol=1e-5)

    # 3) explicit 2-step grid (v7x-style megacore split), masked path
    out_2 = jax.block_until_ready(
        attention_mask_forward(query, key, value, mask, grid_steps=2))
    assert jnp.allclose(out_2, ref_m, atol=1e-5, rtol=1e-5)

    # 4) bf16 input path (f32 accumulation) -> loose tolerance
    out_bf = jax.block_until_ready(
        attention_mask_forward(query, key, value, mask,
                               compute_dtype=jnp.bfloat16))
    assert jnp.allclose(out_bf, ref_m, atol=1e-1, rtol=1e-1)

    print("KERNEL_OK")
</pallas_src>

<mosaic_0001>
module attributes {stable_mosaic.version = 11 : i64} {
  func.func @kernel(%arg0: i32, %arg1: memref<4x4x16x16xf32, #tpu.memory_space<vmem>>, %arg2: memref<4x4x16x16xf32, #tpu.memory_space<vmem>>, %arg3: memref<4x4x16x16xf32, #tpu.memory_space<vmem>>) attributes {dimension_semantics = [#tpu.dimension_semantics<parallel>], iteration_bounds = array<i64: 1>, scalar_prefetch = 0 : i64, scratch_operands = 0 : i64, tpu.core_type = #tpu.core_type<tc>, window_params = [{transform_indices = @transform_0, window_bounds = array<i64: 4, 4, 16, 16>}, {transform_indices = @transform_1, window_bounds = array<i64: 4, 4, 16, 16>}, {transform_indices = @transform_2, window_bounds = array<i64: 4, 4, 16, 16>}]} {
    %c0 = arith.constant 0 : index
    %c0_0 = arith.constant 0 : index
    %c0_1 = arith.constant 0 : index
    %c0_2 = arith.constant 0 : index
    %0 = vector.load %arg1[%c0, %c0_0, %c0_1, %c0_2] : memref<4x4x16x16xf32, #tpu.memory_space<vmem>>, vector<4x4x16x16xf32>
    %cst = arith.constant 2.500000e-01 : f32
    %1 = vector.broadcast %cst : f32 to vector<4x4x16x16xf32>
    %2 = arith.mulf %0, %1 : vector<4x4x16x16xf32>
    %c0_3 = arith.constant 0 : index
    %c0_4 = arith.constant 0 : index
    %c0_5 = arith.constant 0 : index
    %c0_6 = arith.constant 0 : index
    %3 = vector.load %arg2[%c0_3, %c0_4, %c0_5, %c0_6] : memref<4x4x16x16xf32, #tpu.memory_space<vmem>>, vector<4x4x16x16xf32>
    %4 = vector.extract_strided_slice %2 {offsets = [0, 0, 0, 0], sizes = [1, 4, 16, 16], strides = [1, 1, 1, 1]} : vector<4x4x16x16xf32> to vector<1x4x16x16xf32>
    %5 = vector.shape_cast %4 : vector<1x4x16x16xf32> to vector<4x16x16xf32>
    %6 = vector.extract_strided_slice %3 {offsets = [0, 0, 0, 0], sizes = [4, 1, 16, 16], strides = [1, 1, 1, 1]} : vector<4x4x16x16xf32> to vector<4x1x16x16xf32>
    %7 = vector.shape_cast %6 : vector<4x1x16x16xf32> to vector<4x16x16xf32>
    "tpu.trace_start"() <{level = 10 : i32, message = "hsd,hdx->hsx"}> : () -> ()
    %cst_7 = arith.constant dense<0.000000e+00> : vector<4x16x16xf32>
    %8 = tpu.matmul %5, %7, %cst_7 {dimension_numbers = #tpu.dot_dimension_numbers<[2], [1], [1], [2], [0, 0, 0, 1, 1, 2], [0], [0]>} : vector<4x16x16xf32>, vector<4x16x16xf32>, vector<4x16x16xf32> -> vector<4x16x16xf32>
    "tpu.trace_stop"() : () -> ()
    %c0_8 = arith.constant 0 : index
    %c0_9 = arith.constant 0 : index
    %c0_10 = arith.constant 0 : index
    %c0_11 = arith.constant 0 : index
    %9 = vector.load %arg3[%c0_8, %c0_9, %c0_10, %c0_11] : memref<4x4x16x16xf32, #tpu.memory_space<vmem>>, vector<1x4x16x16xf32>
    %10 = vector.shape_cast %9 : vector<1x4x16x16xf32> to vector<4x16x16xf32>
    %11 = vector.shape_cast %8 : vector<4x16x16xf32> to vector<1x4x16x16xf32>
    tpu.vector_store %arg3[%c0_8, %c0_9, %c0_10, %c0_11], %11 {strides = array<i32>} : memref<4x4x16x16xf32, #tpu.memory_space<vmem>>, vector<1x4x16x16xf32>,
    %12 = vector.extract_strided_slice %2 {offsets = [1, 0, 0, 0], sizes = [1, 4, 16, 16], strides = [1, 1, 1, 1]} : vector<4x4x16x16xf32> to vector<1x4x16x16xf32>
    %13 = vector.shape_cast %12 : vector<1x4x16x16xf32> to vector<4x16x16xf32>
    %14 = vector.extract_strided_slice %3 {offsets = [0, 1, 0, 0], sizes = [4, 1, 16, 16], strides = [1, 1, 1, 1]} : vector<4x4x16x16xf32> to vector<4x1x16x16xf32>
    %15 = vector.shape_cast %14 : vector<4x1x16x16xf32> to vector<4x16x16xf32>
    "tpu.trace_start"() <{level = 10 : i32, message = "hsd,hdx->hsx"}> : () -> ()
    %cst_12 = arith.constant dense<0.000000e+00> : vector<4x16x16xf32>
    %16 = tpu.matmul %13, %15, %cst_12 {dimension_numbers = #tpu.dot_dimension_numbers<[2], [1], [1], [2], [0, 0, 0, 1, 1, 2], [0], [0]>} : vector<4x16x16xf32>, vector<4x16x16xf32>, vector<4x16x16xf32> -> vector<4x16x16xf32>
    "tpu.trace_stop"() : () -> ()
    %c1 = arith.constant 1 : index
    %c0_13 = arith.constant 0 : index
    %c0_14 = arith.constant 0 : index
    %c0_15 = arith.constant 0 : index
    %17 = vector.load %arg3[%c1, %c0_13, %c0_14, %c0_15] : memref<4x4x16x16xf32, #tpu.memory_space<vmem>>, vector<1x4x16x16xf32>
    %18 = vector.shape_cast %17 : vector<1x4x16x16xf32> to vector<4x16x16xf32>
    %19 = vector.shape_cast %16 : vector<4x16x16xf32> to vector<1x4x16x16xf32>
    tpu.vector_store %arg3[%c1, %c0_13, %c0_14, %c0_15], %19 {strides = array<i32>} : memref<4x4x16x16xf32, #tpu.memory_space<vmem>>, vector<1x4x16x16xf32>,
    %20 = vector.extract_strided_slice %2 {offsets = [2, 0, 0, 0], sizes = [1, 4, 16, 16], strides = [1, 1, 1, 1]} : vector<4x4x16x16xf32> to vector<1x4x16x16xf32>
    %21 = vector.shape_cast %20 : vector<1x4x16x16xf32> to vector<4x16x16xf32>
    %22 = vector.extract_strided_slice %3 {offsets = [0, 2, 0, 0], sizes = [4, 1, 16, 16], strides = [1, 1, 1, 1]} : vector<4x4x16x16xf32> to vector<4x1x16x16xf32>
    %23 = vector.shape_cast %22 : vector<4x1x16x16xf32> to vector<4x16x16xf32>
    "tpu.trace_start"() <{level = 10 : i32, message = "hsd,hdx->hsx"}> : () -> ()
    %cst_16 = arith.constant dense<0.000000e+00> : vector<4x16x16xf32>
    %24 = tpu.matmul %21, %23, %cst_16 {dimension_numbers = #tpu.dot_dimension_numbers<[2], [1], [1], [2], [0, 0, 0, 1, 1, 2], [0], [0]>} : vector<4x16x16xf32>, vector<4x16x16xf32>, vector<4x16x16xf32> -> vector<4x16x16xf32>
    "tpu.trace_stop"() : () -> ()
    %c2 = arith.constant 2 : index
    %c0_17 = arith.constant 0 : index
    %c0_18 = arith.constant 0 : index
    %c0_19 = arith.constant 0 : index
    %25 = vector.load %arg3[%c2, %c0_17, %c0_18, %c0_19] : memref<4x4x16x16xf32, #tpu.memory_space<vmem>>, vector<1x4x16x16xf32>
    %26 = vector.shape_cast %25 : vector<1x4x16x16xf32> to vector<4x16x16xf32>
    %27 = vector.shape_cast %24 : vector<4x16x16xf32> to vector<1x4x16x16xf32>
    tpu.vector_store %arg3[%c2, %c0_17, %c0_18, %c0_19], %27 {strides = array<i32>} : memref<4x4x16x16xf32, #tpu.memory_space<vmem>>, vector<1x4x16x16xf32>,
    %28 = vector.extract_strided_slice %2 {offsets = [3, 0, 0, 0], sizes = [1, 4, 16, 16], strides = [1, 1, 1, 1]} : vector<4x4x16x16xf32> to vector<1x4x16x16xf32>
    %29 = vector.shape_cast %28 : vector<1x4x16x16xf32> to vector<4x16x16xf32>
    %30 = vector.extract_strided_slice %3 {offsets = [0, 3, 0, 0], sizes = [4, 1, 16, 16], strides = [1, 1, 1, 1]} : vector<4x4x16x16xf32> to vector<4x1x16x16xf32>
    %31 = vector.shape_cast %30 : vector<4x1x16x16xf32> to vector<4x16x16xf32>
    "tpu.trace_start"() <{level = 10 : i32, message = "hsd,hdx->hsx"}> : () -> ()
    %cst_20 = arith.constant dense<0.000000e+00> : vector<4x16x16xf32>
    %32 = tpu.matmul %29, %31, %cst_20 {dimension_numbers = #tpu.dot_dimension_numbers<[2], [1], [1], [2], [0, 0, 0, 1, 1, 2], [0], [0]>} : vector<4x16x16xf32>, vector<4x16x16xf32>, vector<4x16x16xf32> -> vector<4x16x16xf32>
    "tpu.trace_stop"() : () -> ()
    %c3 = arith.constant 3 : index
    %c0_21 = arith.constant 0 : index
    %c0_22 = arith.constant 0 : index
    %c0_23 = arith.constant 0 : index
    %33 = vector.load %arg3[%c3, %c0_21, %c0_22, %c0_23] : memref<4x4x16x16xf32, #tpu.memory_space<vmem>>, vector<1x4x16x16xf32>
    %34 = vector.shape_cast %33 : vector<1x4x16x16xf32> to vector<4x16x16xf32>
    %35 = vector.shape_cast %32 : vector<4x16x16xf32> to vector<1x4x16x16xf32>
    tpu.vector_store %arg3[%c3, %c0_21, %c0_22, %c0_23], %35 {strides = array<i32>} : memref<4x4x16x16xf32, #tpu.memory_space<vmem>>, vector<1x4x16x16xf32>,
    return
  }
  func.func @transform_0(%arg0: i32) -> (i32, i32, i32, i32) {
    %c0_i32 = arith.constant 0 : i32
    %c0_i32_0 = arith.constant 0 : i32
    %c0_i32_1 = arith.constant 0 : i32
    %c0_i32_2 = arith.constant 0 : i32
    return %arg0, %c0_i32, %c0_i32_0, %c0_i32_1 : i32, i32, i32, i32
  }
  func.func @transform_1(%arg0: i32) -> (i32, i32, i32, i32) {
    %c0_i32 = arith.constant 0 : i32
    %c0_i32_0 = arith.constant 0 : i32
    %c0_i32_1 = arith.constant 0 : i32
    %c0_i32_2 = arith.constant 0 : i32
    return %c0_i32, %arg0, %c0_i32_0, %c0_i32_1 : i32, i32, i32, i32
  }
  func.func @transform_2(%arg0: i32) -> (i32, i32, i32, i32) {
    %c0_i32 = arith.constant 0 : i32
    %c0_i32_0 = arith.constant 0 : i32
    %c0_i32_1 = arith.constant 0 : i32
    %c0_i32_2 = arith.constant 0 : i32
    return %arg0, %c0_i32, %c0_i32_0, %c0_i32_1 : i32, i32, i32, i32
  }
}

</mosaic_0001>

<bundles_post_ra>
// kernel: tpu_custom_call.1
= control target key start
LH: loop header
LB: loop body
LE: loop exit
PB: predicated region body
PF: predicated region fallthrough
CT: control target
= control target key end

     0   :  { %7 = vsyncpa [#allocation3], 0  ;;  %s877_s0 = inlined_call_operand.hbm [shape: f32[4,4,16,16], index: 0, kind: input, shape index: {}]   ;;  %s878_s1 = inlined_call_operand.hbm [shape: f32[4,4,16,16], index: 1, kind: input, shape index: {}]   ;;  %s879_s2 = inlined_call_operand.hbm [shape: f32[4,4,16,16], index: 2, kind: output, shape index: {}]  }
   0x1   :  { %8 = vsyncpa [#allocation6], 0 }
   0x2   :  { %9 = vsyncpa [#allocation4], 0  ;;  %s14_s11 = sshll.u32 %s877_s0, 4  ;;  %s775_s12 = smov [#allocation2]   ;;  %s15_s11 = int_to_ptr.hbm [resolvable:$true] %s14_s11 }
   0x3   :  { %s16_s13 = sshll.u32 %s775_s12, 4  ;;  %s27_s16 = sshll.u32 %s878_s1, 4  ;;  %s17_s13 = int_to_ptr.vmem [resolvable:$true] %s16_s13  ;;  %s28_s16 = int_to_ptr.hbm [resolvable:$true] %s27_s16 }
   0x4   :  { %s776_s17 = smov 128   ;;  %s777_s18 = smov 8  }
   0x5   :  { %22 = dma.hbm_to_vmem [thread:$0]  %s15_s11, 4096, %s17_s13, [#allocation3], %s776_s17, %s776_s17, %s777_s18  }
   0x6   :  { %s778_s19 = smov [#allocation5]  }
   0x7   :  { %s29_s20 = sshll.u32 %s778_s19, 4  ;;  %s30_s20 = int_to_ptr.vmem [resolvable:$true] %s29_s20 }
   0x8   :  { %35 = dma.hbm_to_vmem [thread:$0]  %s28_s16, 4096, %s30_s20, [#allocation6], %s776_s17, %s776_s17, %s777_s18  }
   0x9   :  { %769 = dma.done.wait [#allocation3], 4096  }
   0xa   :  { %770 = vsyncadd [#allocation3], 4294963200 }
   0xb   :  { %771 = dma.done.wait [#allocation6], 4096  }
   0xc   :  { %772 = vsyncadd [#allocation6], 4294963200  ;;  %v125_v0 = vld [vmem:[#allocation5 + $0x88] sm:$0xff]  ;;  %v124_v2 = vld [vmem:[#allocation5 + $0x80] sm:$0xff]  ;;  %vm140_vm0 = vcmask 130048   ;;  %s779_s0 = smov [#allocation7]  }
   0xd   :  { %v133_v1 = vld [vmem:[#allocation5 + $0xc8] sm:$0xff]  ;;  %219 = vmatpush.msra.mxu2 %v125_v0  ;;  %v132_v3 = vld [vmem:[#allocation5 + $0xc0] sm:$0xff]  ;;  %v50_v5 = vld [vmem:[#allocation2 + $0x30] sm:$0xff]  ;;  %s644_s1 = sshll.u32 %s779_s0, 4  ;;  %s646_s23 = sshll.u32 %s879_s2, 4  ;;  %s645_s1 = int_to_ptr.vmem [resolvable:$true] %s644_s1  ;;  %s647_s23 = int_to_ptr.hbm [resolvable:$true] %s646_s23 }
   0xe   :  { %248 = vmatpush.msra.mxu3 %v133_v1  ;;  %v48_v4 = vld [vmem:[#allocation2 + $0x20] sm:$0xff]  ;;  %v82_v7 = vmul.f32 0.25, %v50_v5  ;;  %v127_v8 = vld [vmem:[#allocation5 + $0x98] sm:$0xff]  ;;  %v109_v10 = vld [vmem:[#allocation5 + $0x8] sm:$0xff] }
   0xf   :  { %v80_v6 = vmul.f32 0.25, %v48_v4  ;;  %v135_v9 = vld [vmem:[#allocation5 + $0xd8] sm:$0xff]  ;;  %220 = vmatpush.msra.mxu2 %v124_v2  ;;  %v117_v11 = vld [vmem:[#allocation5 + $0x48] sm:$0xff]  ;;  %v108_v12 = vld [vmem:[#allocation5] sm:$0xff]  ;;  %161 = vmatpush.msra.mxu0 %v109_v10 }
  0x10   :  { %249 = vmatpush.msra.mxu3 %v132_v3  ;;  %v44_v13 = vld [vmem:[#allocation2] sm:$0xff]  ;;  %v46_v14 = vld [vmem:[#allocation2 + $0x10] sm:$0xff]  ;;  %v49_v18 = vld [vmem:[#allocation2 + $0x28] sm:$0xff]  ;;  %190 = vmatpush.msra.mxu1 %v117_v11 }
  0x11   :  { %664 = vmatmul.msk.f32.vlgmr.msra.gmra.mxu2 %vm140_vm0, %v80_v6  ;;  %666 = vmatmul.msk.f32.vlgmr.msra.gmra.mxu3 %vm140_vm0, %v82_v7  ;;  %v116_v15 = vld [vmem:[#allocation5 + $0x40] sm:$0xff]  ;;  %v76_v16 = vmul.f32 0.25, %v44_v13  ;;  %v78_v17 = vmul.f32 0.25, %v46_v14  ;;  %v51_v19 = vld [vmem:[#allocation2 + $0x38] sm:$0xff]  ;;  %v126_v20 = vld [vmem:[#allocation5 + $0x90] sm:$0xff]  ;;  %v81_v24 = vmul.f32 0.25, %v49_v18 }
  0x12   :  { %343 = vmatpush.msrb.mxu2 %v127_v8  ;;  %372 = vmatpush.msrb.mxu3 %v135_v9  ;;  %v134_v21 = vld [vmem:[#allocation5 + $0xd0] sm:$0xff]  ;;  %v111_v22 = vld [vmem:[#allocation5 + $0x18] sm:$0xff]  ;;  %v83_v25 = vmul.f32 0.25, %v51_v19  ;;  %v129_v26 = vld [vmem:[#allocation5 + $0xa8] sm:$0xff] }
  0x13   :  { %v119_v23 = vld [vmem:[#allocation5 + $0x58] sm:$0xff]  ;;  %162 = vmatpush.msra.mxu0 %v108_v12  ;;  %191 = vmatpush.msra.mxu1 %v116_v15  ;;  %v45_v27 = vld [vmem:[#allocation2 + $0x8] sm:$0xff]  ;;  %v110_v30 = vld [vmem:[#allocation5 + $0x10] sm:$0xff] }
  0x14   :  { %344 = vmatpush.msrb.mxu2 %v126_v20  ;;  %373 = vmatpush.msrb.mxu3 %v134_v21  ;;  %v137_v28 = vld [vmem:[#allocation5 + $0xe8] sm:$0xff]  ;;  %v47_v29 = vld [vmem:[#allocation2 + $0x18] sm:$0xff]  ;;  %v118_v31 = vld [vmem:[#allocation5 + $0x50] sm:$0xff]  ;;  %v77_v37 = vmul.f32 0.25, %v45_v27 }
  0x15   :  { %660 = vmatmul.msk.f32.vlgmr.msra.gmra.mxu0 %vm140_vm0, %v76_v16  ;;  %662 = vmatmul.msk.f32.vlgmr.msra.gmra.mxu1 %vm140_vm0, %v78_v17  ;;  %v113_v32 = vld [vmem:[#allocation5 + $0x28] sm:$0xff]  ;;  %v56_v34 = vld [vmem:[#allocation2 + $0x60] sm:$0xff]  ;;  %v79_v38 = vmul.f32 0.25, %v47_v29  ;;  %v58_v39 = vld [vmem:[#allocation2 + $0x70] sm:$0xff] }
  0x16   :  { %285 = vmatpush.msrb.mxu0 %v111_v22  ;;  %314 = vmatpush.msrb.mxu1 %v119_v23  ;;  %v121_v33 = vld [vmem:[#allocation5 + $0x68] sm:$0xff]  ;;  %v128_v35 = vld [vmem:[#allocation5 + $0xa0] sm:$0xff]  ;;  %v88_v42 = vmul.f32 0.25, %v56_v34  ;;  %v90_v43 = vmul.f32 0.25, %v58_v39  ;;  %v54_v45 = vld [vmem:[#allocation2 + $0x50] sm:$0xff] }
  0x17   :  { %468 = vmatpush.msra.mxu2 %v129_v26  ;;  %497 = vmatpush.msra.mxu3 %v137_v28  ;;  %v136_v36 = vld [vmem:[#allocation5 + $0xe0] sm:$0xff]  ;;  %v131_v46 = vld [vmem:[#allocation5 + $0xb8] sm:$0xff]  ;;  %v130_v48 = vld [vmem:[#allocation5 + $0xb0] sm:$0xff]  ;;  %v86_v51 = vmul.f32 0.25, %v54_v45 }
  0x18   :  { %286 = vmatpush.msrb.mxu0 %v110_v30  ;;  %315 = vmatpush.msrb.mxu1 %v118_v31  ;;  %v112_v40 = vld [vmem:[#allocation5 + $0x20] sm:$0xff]  ;;  %v139_v47 = vld [vmem:[#allocation5 + $0xf8] sm:$0xff]  ;;  %v138_v49 = vld [vmem:[#allocation5 + $0xf0] sm:$0xff] }
  0x19   :  { %665 = vmatmul.msk.f32.gmra.mxu2 %vm140_vm0, %v81_v24  ;;  %667 = vmatmul.msk.f32.gmra.mxu3 %vm140_vm0, %v83_v25  ;;  %v120_v41 = vld [vmem:[#allocation5 + $0x60] sm:$0xff]  ;;  %v57_v52 = vld [vmem:[#allocation2 + $0x68] sm:$0xff]  ;;  %v59_v53 = vld [vmem:[#allocation2 + $0x78] sm:$0xff] }
  0x1a   :  { %410 = vmatpush.msra.mxu0 %v113_v32  ;;  %439 = vmatpush.msra.mxu1 %v121_v33  ;;  %v52_v44 = vld [vmem:[#allocation2 + $0x40] sm:$0xff]  ;;  %v115_v54 = vld [vmem:[#allocation5 + $0x38] sm:$0xff]  ;;  %v89_v56 = vmul.f32 0.25, %v57_v52  ;;  %v91_v57 = vmul.f32 0.25, %v59_v53  ;;  %v53_v58 = vld [vmem:[#allocation2 + $0x48] sm:$0xff] }
  0x1b   :  { %469 = vmatpush.msra.mxu2 %v128_v35  ;;  %498 = vmatpush.msra.mxu3 %v136_v36  ;;  %v84_v50 = vmul.f32 0.25, %v52_v44  ;;  %v123_v55 = vld [vmem:[#allocation5 + $0x78] sm:$0xff]  ;;  %v114_v60 = vld [vmem:[#allocation5 + $0x30] sm:$0xff]  ;;  %v85_v62 = vmul.f32 0.25, %v53_v58  ;;  %v64_v0 = vld [vmem:[#allocation2 + $0xa0] sm:$0xff] }
  0x1c   :  { %411 = vmatpush.msra.mxu0 %v112_v40  ;;  %440 = vmatpush.msra.mxu1 %v120_v41  ;;  %v55_v59 = vld [vmem:[#allocation2 + $0x58] sm:$0xff]  ;;  %v122_v61 = vld [vmem:[#allocation5 + $0x70] sm:$0xff]  ;;  %v96_v2 = vmul.f32 0.25, %v64_v0  ;;  %v60_v4 = vld [vmem:[#allocation2 + $0x80] sm:$0xff] }
  0x1d   :  { %661 = vmatmul.msk.f32.gmra.mxu0 %vm140_vm0, %v77_v37  ;;  %663 = vmatmul.msk.f32.gmra.mxu1 %vm140_vm0, %v79_v38  ;;  %v87_v63 = vmul.f32 0.25, %v55_v59  ;;  %v66_v1 = vld [vmem:[#allocation2 + $0xb0] sm:$0xff]  ;;  %v92_v6 = vmul.f32 0.25, %v60_v4  ;;  %v65_v8 = vld [vmem:[#allocation2 + $0xa8] sm:$0xff]  ;;  %v67_v9 = vld [vmem:[#allocation2 + $0xb8] sm:$0xff] }
  0x1e   :  { %v98_v3 = vmul.f32 0.25, %v66_v1  ;;  %v62_v5 = vld [vmem:[#allocation2 + $0x90] sm:$0xff]  ;;  %v97_v10 = vmul.f32 0.25, %v65_v8  ;;  %v99_v11 = vmul.f32 0.25, %v67_v9  ;;  %v61_v12 = vld [vmem:[#allocation2 + $0x88] sm:$0xff]  ;;  %v63_v13 = vld [vmem:[#allocation2 + $0x98] sm:$0xff] }
  0x1f   :  { %v94_v7 = vmul.f32 0.25, %v62_v5  ;;  %v93_v14 = vmul.f32 0.25, %v61_v12  ;;  %v95_v15 = vmul.f32 0.25, %v63_v13  ;;  %v72_v16 = vld [vmem:[#allocation2 + $0xe0] sm:$0xff]  ;;  %v74_v17 = vld [vmem:[#allocation2 + $0xf0] sm:$0xff]  ;;  %v73_v24 = vld [vmem:[#allocation2 + $0xe8] sm:$0xff] }
  0x20   :  { %v104_v18 = vmul.f32 0.25, %v72_v16  ;;  %v106_v19 = vmul.f32 0.25, %v74_v17  ;;  %v68_v20 = vld [vmem:[#allocation2 + $0xc0] sm:$0xff]  ;;  %v70_v21 = vld [vmem:[#allocation2 + $0xd0] sm:$0xff]  ;;  %v75_v25 = vld [vmem:[#allocation2 + $0xf8] sm:$0xff]  ;;  %v105_v26 = vmul.f32 0.25, %v73_v24 }
  0x21   :  { %672 = vmatmul.msk.f32.vlgmr.msrb.gmra.mxu2 %vm140_vm0, %v88_v42  ;;  %674 = vmatmul.msk.f32.vlgmr.msrb.gmra.mxu3 %vm140_vm0, %v90_v43  ;;  %v100_v22 = vmul.f32 0.25, %v68_v20  ;;  %v102_v23 = vmul.f32 0.25, %v70_v21  ;;  %v107_v27 = vmul.f32 0.25, %v75_v25  ;;  %v69_v28 = vld [vmem:[#allocation2 + $0xc8] sm:$0xff]  ;;  %v71_v29 = vld [vmem:[#allocation2 + $0xd8] sm:$0xff] }
  0x22   :  { %593 = vmatpush.msrb.mxu2 %v131_v46  ;;  %622 = vmatpush.msrb.mxu3 %v139_v47  ;;  %v101_v30 = vmul.f32 0.25, %v69_v28  ;;  %v103_v31 = vmul.f32 0.25, %v71_v29 }
  0x24   :  { %594 = vmatpush.msrb.mxu2 %v130_v48  ;;  %623 = vmatpush.msrb.mxu3 %v138_v49 }
  0x25   :  { %668 = vmatmul.msk.f32.vlgmr.msrb.gmra.mxu0 %vm140_vm0, %v84_v50  ;;  %670 = vmatmul.msk.f32.vlgmr.msrb.gmra.mxu1 %vm140_vm0, %v86_v51 }
  0x26   :  { %535 = vmatpush.msrb.mxu0 %v115_v54  ;;  %564 = vmatpush.msrb.mxu1 %v123_v55 }
  0x28   :  { %536 = vmatpush.msrb.mxu0 %v114_v60  ;;  %565 = vmatpush.msrb.mxu1 %v122_v61 }
  0x29   :  { %673 = vmatmul.msk.f32.gmra.mxu2 %vm140_vm0, %v89_v56  ;;  %675 = vmatmul.msk.f32.gmra.mxu3 %vm140_vm0, %v91_v57 }
  0x2d   :  { %669 = vmatmul.msk.f32.gmra.mxu0 %vm140_vm0, %v85_v62  ;;  %671 = vmatmul.msk.f32.gmra.mxu1 %vm140_vm0, %v87_v63 }
  0x31   :  { %680 = vmatmul.msk.f32.vlgmr.msra.gmra.mxu2 %vm140_vm0, %v96_v2  ;;  %682 = vmatmul.msk.f32.vlgmr.msra.gmra.mxu3 %vm140_vm0, %v98_v3 }
  0x35   :  { %676 = vmatmul.msk.f32.vlgmr.msra.gmra.mxu0 %vm140_vm0, %v92_v6  ;;  %678 = vmatmul.msk.f32.vlgmr.msra.gmra.mxu1 %vm140_vm0, %v94_v7 }
  0x39   :  { %681 = vmatmul.msk.f32.gmra.mxu2 %vm140_vm0, %v97_v10  ;;  %683 = vmatmul.msk.f32.gmra.mxu3 %vm140_vm0, %v99_v11 }
  0x3d   :  { %677 = vmatmul.msk.f32.gmra.mxu0 %vm140_vm0, %v93_v14  ;;  %679 = vmatmul.msk.f32.gmra.mxu1 %vm140_vm0, %v95_v15 }
  0x41   :  { %688 = vmatmul.msk.f32.vlgmr.msrb.gmra.mxu2 %vm140_vm0, %v104_v18  ;;  %690 = vmatmul.msk.f32.vlgmr.msrb.gmra.mxu3 %vm140_vm0, %v106_v19 }
  0x45   :  { %684 = vmatmul.msk.f32.vlgmr.msrb.gmra.mxu0 %vm140_vm0, %v100_v22  ;;  %686 = vmatmul.msk.f32.vlgmr.msrb.gmra.mxu1 %vm140_vm0, %v102_v23 }
  0x49   :  { %689 = vmatmul.msk.f32.gmra.mxu2 %vm140_vm0, %v105_v26  ;;  %691 = vmatmul.msk.f32.gmra.mxu3 %vm140_vm0, %v107_v27 }
  0x4d   :  { %685 = vmatmul.msk.f32.gmra.mxu0 %vm140_vm0, %v101_v30  ;;  %687 = vmatmul.msk.f32.gmra.mxu1 %vm140_vm0, %v103_v31 }
  0x92   :  { %v164_v32 = vpop.f32.mrf.mxu0  ;;  %v193_v33 = vpop.f32.mrf.mxu1 }
  0x93   :  { %257 = vst.msk [vmem:[#allocation7] sm:$0xff] %vm140_vm0, %v164_v32 }
  0x94   :  { %v222_v34 = vpop.f32.mrf.mxu2  ;;  %v251_v35 = vpop.f32.mrf.mxu3  ;;  %259 = vst.msk [vmem:[#allocation7 + $0x10] sm:$0xff] %vm140_vm0, %v193_v33 }
  0x95   :  { %261 = vst.msk [vmem:[#allocation7 + $0x20] sm:$0xff] %vm140_vm0, %v222_v34 }
  0x96   :  { %263 = vst.msk [vmem:[#allocation7 + $0x30] sm:$0xff] %vm140_vm0, %v251_v35 }
  0x9a   :  { %v167_v36 = vpop.f32.mrf.mxu0  ;;  %v196_v37 = vpop.f32.mrf.mxu1 }
  0x9b   :  { %258 = vst.msk [vmem:[#allocation7 + $0x8] sm:$0xff] %vm140_vm0, %v167_v36 }
  0x9c   :  { %v225_v38 = vpop.f32.mrf.mxu2  ;;  %v254_v39 = vpop.f32.mrf.mxu3  ;;  %260 = vst.msk [vmem:[#allocation7 + $0x18] sm:$0xff] %vm140_vm0, %v196_v37 }
  0x9d   :  { %262 = vst.msk [vmem:[#allocation7 + $0x28] sm:$0xff] %vm140_vm0, %v225_v38 }
  0x9e   :  { %264 = vst.msk [vmem:[#allocation7 + $0x38] sm:$0xff] %vm140_vm0, %v254_v39 }
  0xa2   :  { %v288_v40 = vpop.f32.mrf.mxu0  ;;  %v317_v41 = vpop.f32.mrf.mxu1 }
  0xa3   :  { %382 = vst.msk [vmem:[#allocation7 + $0x40] sm:$0xff] %vm140_vm0, %v288_v40 }
  0xa4   :  { %v346_v42 = vpop.f32.mrf.mxu2  ;;  %v375_v43 = vpop.f32.mrf.mxu3  ;;  %384 = vst.msk [vmem:[#allocation7 + $0x50] sm:$0xff] %vm140_vm0, %v317_v41 }
  0xa5   :  { %386 = vst.msk [vmem:[#allocation7 + $0x60] sm:$0xff] %vm140_vm0, %v346_v42 }
  0xa6   :  { %388 = vst.msk [vmem:[#allocation7 + $0x70] sm:$0xff] %vm140_vm0, %v375_v43 }
  0xaa   :  { %v291_v44 = vpop.f32.mrf.mxu0  ;;  %v320_v45 = vpop.f32.mrf.mxu1 }
  0xab   :  { %383 = vst.msk [vmem:[#allocation7 + $0x48] sm:$0xff] %vm140_vm0, %v291_v44 }
  0xac   :  { %v349_v46 = vpop.f32.mrf.mxu2  ;;  %v378_v47 = vpop.f32.mrf.mxu3  ;;  %385 = vst.msk [vmem:[#allocation7 + $0x58] sm:$0xff] %vm140_vm0, %v320_v45 }
  0xad   :  { %387 = vst.msk [vmem:[#allocation7 + $0x68] sm:$0xff] %vm140_vm0, %v349_v46 }
  0xae   :  { %389 = vst.msk [vmem:[#allocation7 + $0x78] sm:$0xff] %vm140_vm0, %v378_v47 }
  0xb2   :  { %v413_v48 = vpop.f32.mrf.mxu0  ;;  %v442_v49 = vpop.f32.mrf.mxu1 }
  0xb3   :  { %507 = vst.msk [vmem:[#allocation7 + $0x80] sm:$0xff] %vm140_vm0, %v413_v48 }
  0xb4   :  { %v471_v50 = vpop.f32.mrf.mxu2  ;;  %v500_v51 = vpop.f32.mrf.mxu3  ;;  %509 = vst.msk [vmem:[#allocation7 + $0x90] sm:$0xff] %vm140_vm0, %v442_v49 }
  0xb5   :  { %511 = vst.msk [vmem:[#allocation7 + $0xa0] sm:$0xff] %vm140_vm0, %v471_v50 }
  0xb6   :  { %513 = vst.msk [vmem:[#allocation7 + $0xb0] sm:$0xff] %vm140_vm0, %v500_v51 }
  0xba   :  { %v416_v52 = vpop.f32.mrf.mxu0  ;;  %v445_v53 = vpop.f32.mrf.mxu1 }
  0xbb   :  { %508 = vst.msk [vmem:[#allocation7 + $0x88] sm:$0xff] %vm140_vm0, %v416_v52 }
  0xbc   :  { %v474_v54 = vpop.f32.mrf.mxu2  ;;  %v503_v55 = vpop.f32.mrf.mxu3  ;;  %510 = vst.msk [vmem:[#allocation7 + $0x98] sm:$0xff] %vm140_vm0, %v445_v53 }
  0xbd   :  { %512 = vst.msk [vmem:[#allocation7 + $0xa8] sm:$0xff] %vm140_vm0, %v474_v54 }
  0xbe   :  { %514 = vst.msk [vmem:[#allocation7 + $0xb8] sm:$0xff] %vm140_vm0, %v503_v55 }
  0xc2   :  { %v538_v56 = vpop.f32.mrf.mxu0  ;;  %v567_v57 = vpop.f32.mrf.mxu1 }
  0xc3   :  { %632 = vst.msk [vmem:[#allocation7 + $0xc0] sm:$0xff] %vm140_vm0, %v538_v56 }
  0xc4   :  { %v596_v58 = vpop.f32.mrf.mxu2  ;;  %v625_v59 = vpop.f32.mrf.mxu3  ;;  %634 = vst.msk [vmem:[#allocation7 + $0xd0] sm:$0xff] %vm140_vm0, %v567_v57 }
  0xc5   :  { %636 = vst.msk [vmem:[#allocation7 + $0xe0] sm:$0xff] %vm140_vm0, %v596_v58 }
  0xc6   :  { %638 = vst.msk [vmem:[#allocation7 + $0xf0] sm:$0xff] %vm140_vm0, %v625_v59 }
  0xca   :  { %v541_v60 = vpop.f32.mrf.mxu0  ;;  %v570_v61 = vpop.f32.mrf.mxu1 }
  0xcb   :  { %633 = vst.msk [vmem:[#allocation7 + $0xc8] sm:$0xff] %vm140_vm0, %v541_v60 }
  0xcc   :  { %v599_v62 = vpop.f32.mrf.mxu2  ;;  %v628_v63 = vpop.f32.mrf.mxu3  ;;  %635 = vst.msk [vmem:[#allocation7 + $0xd8] sm:$0xff] %vm140_vm0, %v570_v61 }
  0xcd   :  { %637 = vst.msk [vmem:[#allocation7 + $0xe8] sm:$0xff] %vm140_vm0, %v599_v62 }
  0xce   :  { %639 = vst.msk [vmem:[#allocation7 + $0xf8] sm:$0xff] %vm140_vm0, %v628_v63 }
  0xcf   :  { %652 = dma.vmem_to_hbm [thread:$0]  %s645_s1, 4096, %s647_s23, [#allocation4], %s776_s17, %s776_s17, %s777_s18  }
  0xd0   :  { %773 = dma.done.wait [#allocation4], 4096  }
  0xd1   :  { %774 = vsyncadd [#allocation4], 4294963200 }
  0xd2   :  { %657 = vsyncpa [#allocation3], 1 }
  0xd3   :  { %658 = vsyncpa [#allocation6], 1 }
  0xd4   :  { %659 = vsyncpa [#allocation4], 1 }

</bundles_post_ra>
